<compile_context>
chip_gen: v7x
topology: tpu7x:2x2x1
jax: 0.10.0
libtpu: 0.0.40
codegen_flags: <defaults>
</compile_context>

<pallas_src>
import jax
import jax.numpy as jnp
import numpy as np
from jax.experimental import pallas as pl
from jax.experimental.pallas import tpu as pltpu


def _make_pool_kernel(n_nodes, tile_n, tiles_per_split, compute_dtype):
    """Streams node tiles: h = relu(x @ W1 + b1); partial[g] += sum over tile."""

    def kernel(x_ref, batch_ref, w1_ref, b1_ref, partial_ref):
        c = pl.program_id(0)          # node-range split (parallel across TCs)
        j = pl.program_id(1)          # tile within this split (reduction axis)
        tile_idx = c * tiles_per_split + j
        n_graphs = partial_ref.shape[0]

        # Init this core's partial accumulator (resident output block) once.
        @pl.when(j == 0)
        def _():
            partial_ref[...] = jnp.zeros_like(partial_ref)

        # ---- fc_vertex + ReLU (bf16 operands by default, f32 accumulate) ----
        x = x_ref[...].astype(compute_dtype)                         # (TILE_N, F)
        h = jnp.dot(x, w1_ref[...],
                    preferred_element_type=jnp.float32) + b1_ref[...]
        h = jnp.maximum(h, 0.0)                                      # (TILE_N, H) f32

        # Zero rows past the end of the node array.  Covers the ragged last
        # tile *and* the clamped duplicate tiles of an uneven core split, so
        # no mask is needed on the one-hot columns.
        row_idx = tile_idx * tile_n + jax.lax.broadcasted_iota(
            jnp.int32, (tile_n, 1), 0)                               # (TILE_N, 1)
        h = jnp.where(row_idx < n_nodes, h, 0.0)

        # ---- global_add_pool: one-hot matmul on the MXU ----------------------
        # One-hot is built directly in the compute dtype (exact in bf16);
        # out-of-range / negative batch ids never match a row -> dropped,
        # matching segment_sum with num_segments.
        seg = batch_ref[...]                                          # (1, TILE_N) i32
        graph_ids = jax.lax.broadcasted_iota(
            jnp.int32, (n_graphs, tile_n), 0)                         # (B, TILE_N)
        onehot = (graph_ids == seg).astype(compute_dtype)
        partial_ref[...] += jnp.dot(onehot, h.astype(compute_dtype),
                                    preferred_element_type=jnp.float32)

    return kernel


def _finalize_kernel(partials_ref, w2_ref, b2_ref, w3_ref, b3_ref, out_ref):
    """Sum per-core partials (exact, f32), then the tiny global MLP + sigmoid."""
    pooled = jnp.sum(partials_ref[...], axis=0)                       # (B, H) f32
    g = jnp.dot(pooled, w2_ref[...],
                preferred_element_type=jnp.float32) + b2_ref[...]
    g = jnp.maximum(g, 0.0)
    logits = jnp.dot(g, w3_ref[...],
                     preferred_element_type=jnp.float32) + b3_ref[...]
    out_ref[...] = jax.nn.sigmoid(logits)


def deep_multisets_forward(x, batch, params, num_graphs, *,
                           tile_n=4096, num_node_splits=2,
                           compute_dtype=jnp.bfloat16):
    """x: (N, F) float32, batch: (N,) int32 graph ids in [0, num_graphs).

    tile_n is clamped to the 128-padded node count (must end up a multiple of
    128).  num_node_splits=2 shards the node axis across the two TensorCores
    on dual-TC chips (v7x); it is harmless on single-TC chips.
    """
    w1, b1, w2, b2, w3, b3 = params
    n_nodes, dim_features = x.shape
    hidden_units = w1.shape[1]
    dim_target = w3.shape[1]

    # Tile sizing: big tiles amortize per-grid-step overhead and make the x DMA
    # bandwidth-bound rather than latency-bound.  VMEM note: the (tile_n, F)
    # f32 block is lane-padded to 128 lanes => tile_n * 512 B per buffer, x2
    # for double buffering -- well under the 32 MiB limit at tile_n=4096.
    padded_nodes = ((n_nodes + 127) // 128) * 128
    tile_n = int(max(128, min(int(tile_n), padded_nodes)))
    assert tile_n % 128 == 0, "tile_n must be a multiple of 128"

    total_tiles = pl.cdiv(n_nodes, tile_n)
    num_splits = int(max(1, min(int(num_node_splits), total_tiles)))
    tiles_per_split = pl.cdiv(total_tiles, num_splits)

    def node_tile(c, j):
        # Clamp so an uneven split never indexes past the last real tile; the
        # kernel's row mask zeroes any duplicate tile's contribution.
        return jnp.minimum(c * tiles_per_split + j, total_tiles - 1)

    batch2d = batch.astype(jnp.int32).reshape(1, -1)
    resident = pl.BlockSpec(memory_space=pltpu.MemorySpace.VMEM)

    pool_kernel = _make_pool_kernel(n_nodes, tile_n, tiles_per_split,
                                    compute_dtype)

    # Stage 1: streamed vertex MLP + pooled partial sums (one (B, H) block per
    # node-axis split; each split owns its own output block -> no races).
    partials = pl.pallas_call(
        pool_kernel,
        out_shape=jax.ShapeDtypeStruct(
            (num_splits, num_graphs, hidden_units), jnp.float32),
        grid=(num_splits, tiles_per_split),
        in_specs=[
            pl.BlockSpec((tile_n, dim_features),
                         lambda c, j: (node_tile(c, j), 0)),          # x (streamed)
            pl.BlockSpec((1, tile_n),
                         lambda c, j: (0, node_tile(c, j))),          # batch ids
            resident,                                                  # w1 (compute dtype)
            resident,                                                  # b1 (f32)
        ],
        out_specs=pl.BlockSpec((None, num_graphs, hidden_units),
                               lambda c, j: (c, 0, 0)),
        compiler_params=pltpu.CompilerParams(
            dimension_semantics=("parallel", "arbitrary"),
            vmem_limit_bytes=32 * 1024 * 1024,        # safe on v5e/v6e/v7x
        ),
    )(x.astype(jnp.float32), batch2d, w1.astype(compute_dtype),
      b1.astype(jnp.float32))

    # Stage 2: trivial gridless kernel -- sum partials, global MLP, sigmoid.
    out = pl.pallas_call(
        _finalize_kernel,
        out_shape=jax.ShapeDtypeStruct((num_graphs, dim_target), jnp.float32),
        in_specs=[resident, resident, resident, resident, resident],
        out_specs=resident,
    )(partials, w2.astype(jnp.float32), b2.astype(jnp.float32),
      w3.astype(jnp.float32), b3.astype(jnp.float32))

    # torch.sigmoid(x.view(-1)) -- sigmoid already applied in kernel.
    return out.reshape(-1)


def init_params(key, dim_features, hidden_units, dim_target):
    """Deterministic init. Weights stored as [in, out] (transposed vs PyTorch)."""
    ks = jax.random.split(key, 6)
    w1 = jax.random.normal(ks[0], (dim_features, hidden_units), jnp.float32) * 0.1
    b1 = jax.random.normal(ks[1], (1, hidden_units), jnp.float32) * 0.1
    w2 = jax.random.normal(ks[2], (hidden_units, hidden_units), jnp.float32) * 0.1
    b2 = jax.random.normal(ks[3], (1, hidden_units), jnp.float32) * 0.1
    w3 = jax.random.normal(ks[4], (hidden_units, dim_target), jnp.float32) * 0.1
    b3 = jax.random.normal(ks[5], (1, dim_target), jnp.float32) * 0.1
    return (w1, b1, w2, b2, w3, b3)


def reference_forward(x, batch, params, num_graphs):
    """Pure-JAX reference mirroring the PyTorch module."""
    w1, b1, w2, b2, w3, b3 = params
    h = jax.nn.relu(x @ w1 + b1)
    pooled = jax.ops.segment_sum(h, batch, num_segments=num_graphs)
    g = jax.nn.relu(pooled @ w2 + b2)
    logits = g @ w3 + b3
    return jax.nn.sigmoid(logits.reshape(-1))


if __name__ == "__main__":
    dim_features = 4
    hidden_units = 32
    dim_target = 3

    key = jax.random.PRNGKey(0)
    kx1, kx2, kp = jax.random.split(key, 3)
    params = init_params(kp, dim_features, hidden_units, dim_target)

    # --- Test 1: tiny batch (2 graphs, 16 nodes), f32 path — exact ----------
    n1, g1 = 16, 2
    x1 = jax.random.normal(kx1, (n1, dim_features), jnp.float32)
    batch1 = jnp.array([0] * 8 + [1] * 8, dtype=jnp.int32)
    out1 = jax.block_until_ready(
        deep_multisets_forward(x1, batch1, params, g1,
                               compute_dtype=jnp.float32))
    ref1 = reference_forward(x1, batch1, params, g1)
    np.testing.assert_allclose(np.asarray(out1), np.asarray(ref1),
                               rtol=1e-5, atol=1e-5)

    # --- Test 2: multi-tile ragged + uneven 2-way split (3 tiles / 2 cores),
    #             f32 path — exact -------------------------------------------
    n2, g2 = 300, 3
    x2 = jax.random.normal(kx2, (n2, dim_features), jnp.float32)
    batch2 = jnp.array([0] * 100 + [1] * 120 + [2] * 80, dtype=jnp.int32)
    out2 = jax.block_until_ready(
        deep_multisets_forward(x2, batch2, params, g2, tile_n=128,
                               compute_dtype=jnp.float32))
    ref2 = reference_forward(x2, batch2, params, g2)
    np.testing.assert_allclose(np.asarray(out2), np.asarray(ref2),
                               rtol=1e-5, atol=1e-5)

    # --- Test 3: defaults (bf16 streamed matmuls, f32 accumulation) ----------
    out3 = jax.block_until_ready(
        deep_multisets_forward(x2, batch2, params, g2))
    np.testing.assert_allclose(np.asarray(out3), np.asarray(ref2),
                               rtol=2e-2, atol=2e-2)

    # --- Test 4: multiple tiles per split, bf16 defaults ----------------------
    n4, g4 = 1024, 4
    kx3, _ = jax.random.split(kx1)
    x4 = jax.random.normal(kx3, (n4, dim_features), jnp.float32)
    sizes = (300, 200, 400, 124)
    batch4 = jnp.concatenate(
        [jnp.full((s,), i, jnp.int32) for i, s in enumerate(sizes)])
    out4 = jax.block_until_ready(
        deep_multisets_forward(x4, batch4, params, g4, tile_n=256))
    ref4 = reference_forward(x4, batch4, params, g4)
    np.testing.assert_allclose(np.asarray(out4), np.asarray(ref4),
                               rtol=2e-2, atol=2e-2)

    print("KERNEL_OK")
</pallas_src>

<mosaic_0001>
module attributes {stable_mosaic.version = 11 : i64} {
  func.func @kernel(%arg0: i32, %arg1: i32, %arg2: memref<128x4xf32, #tpu.memory_space<vmem>>, %arg3: memref<1x128xi32, #tpu.memory_space<vmem>>, %arg4: memref<4x32xf32, #tpu.memory_space<vmem>>, %arg5: memref<1x32xf32, #tpu.memory_space<vmem>>, %arg6: memref<1x2x32xf32, #tpu.memory_space<vmem>>) attributes {dimension_semantics = [#tpu.dimension_semantics<parallel>, #tpu.dimension_semantics<arbitrary>], iteration_bounds = array<i64: 1, 1>, scalar_prefetch = 0 : i64, scratch_operands = 0 : i64, tpu.core_type = #tpu.core_type<tc>, window_params = [{transform_indices = @transform_0, window_bounds = array<i64: 128, 4>}, {transform_indices = @transform_1, window_bounds = array<i64: 1, 128>}, {pipeline_mode = #tpu.pipeline_mode<synchronous>, transform_indices = @transform_2, window_bounds = array<i64: 4, 32>}, {pipeline_mode = #tpu.pipeline_mode<synchronous>, transform_indices = @transform_3, window_bounds = array<i64: 1, 32>}, {transform_indices = @transform_4, window_bounds = array<i64: 1, 2, 32>}]} {
    %c1_i32 = arith.constant 1 : i32
    %0 = arith.muli %arg0, %c1_i32 : i32
    %1 = arith.addi %0, %arg1 : i32
    %c0_i32 = arith.constant 0 : i32
    %2 = arith.cmpi eq, %arg1, %c0_i32 : i32
    %3 = arith.extui %2 : i1 to i32
    %c0_i32_0 = arith.constant 0 : i32
    %4 = arith.cmpi ne, %3, %c0_i32_0 : i32
    scf.if %4 {
      %cst_17 = arith.constant 0.000000e+00 : f32
      %36 = vector.broadcast %cst_17 : f32 to vector<2x32xf32>
      %c0_18 = arith.constant 0 : index
      %c0_19 = arith.constant 0 : index
      %c0_20 = arith.constant 0 : index
      %37 = vector.load %arg6[%c0_18, %c0_19, %c0_20] : memref<1x2x32xf32, #tpu.memory_space<vmem>>, vector<1x2x32xf32>
      %38 = vector.shape_cast %37 : vector<1x2x32xf32> to vector<2x32xf32>
      %39 = vector.shape_cast %36 : vector<2x32xf32> to vector<1x2x32xf32>
      tpu.vector_store %arg6[%c0_18, %c0_19, %c0_20], %39 {strides = array<i32>} : memref<1x2x32xf32, #tpu.memory_space<vmem>>, vector<1x2x32xf32>,
    } else {
    }
    %c0 = arith.constant 0 : index
    %c0_1 = arith.constant 0 : index
    %5 = vector.load %arg2[%c0, %c0_1] : memref<128x4xf32, #tpu.memory_space<vmem>>, vector<128x4xf32>
    %c0_2 = arith.constant 0 : index
    %c0_3 = arith.constant 0 : index
    %6 = vector.load %arg4[%c0_2, %c0_3] : memref<4x32xf32, #tpu.memory_space<vmem>>, vector<4x32xf32>
    %cst = arith.constant dense<0.000000e+00> : vector<128x32xf32>
    %7 = tpu.matmul %5, %6, %cst {dimension_numbers = #tpu.dot_dimension_numbers<[1], [0], [0], [1], [0, 0, 1, 1], [], []>} : vector<128x4xf32>, vector<4x32xf32>, vector<128x32xf32> -> vector<128x32xf32>
    %c0_4 = arith.constant 0 : index
    %c0_5 = arith.constant 0 : index
    %8 = vector.load %arg5[%c0_4, %c0_5] : memref<1x32xf32, #tpu.memory_space<vmem>>, vector<1x32xf32>
    %9 = vector.broadcast %8 : vector<1x32xf32> to vector<128x32xf32>
    %10 = arith.addf %7, %9 : vector<128x32xf32>
    %cst_6 = arith.constant 0.000000e+00 : f32
    %11 = vector.broadcast %cst_6 : f32 to vector<128x32xf32>
    %12 = arith.maximumf %10, %11 : vector<128x32xf32>
    %c128_i32 = arith.constant 128 : i32
    %13 = arith.muli %1, %c128_i32 : i32
    %14 = tpu.iota {dimensions = array<i32: 0>} : vector<128x1xi32>
    %15 = vector.broadcast %13 : i32 to vector<128x1xi32>
    %16 = arith.addi %15, %14 : vector<128x1xi32>
    %c16_i32 = arith.constant 16 : i32
    %17 = vector.broadcast %c16_i32 : i32 to vector<128x1xi32>
    %18 = arith.cmpi slt, %16, %17 : vector<128x1xi32>
    %cst_7 = arith.constant 0.000000e+00 : f32
    %19 = vector.shape_cast %18 : vector<128x1xi1> to vector<128x1xi1>
    %20 = vector.broadcast %19 : vector<128x1xi1> to vector<128x32xi1>
    %21 = vector.broadcast %cst_7 : f32 to vector<128x32xf32>
    %22 = arith.select %20, %12, %21 : vector<128x32xi1>, vector<128x32xf32>
    %c0_8 = arith.constant 0 : index
    %c0_9 = arith.constant 0 : index
    %23 = vector.load %arg3[%c0_8, %c0_9] : memref<1x128xi32, #tpu.memory_space<vmem>>, vector<1x128xi32>
    %24 = tpu.iota {dimensions = array<i32: 0>} : vector<2x128xi32>
    %25 = vector.broadcast %23 : vector<1x128xi32> to vector<2x128xi32>
    %26 = arith.cmpi eq, %24, %25 : vector<2x128xi32>
    %27 = arith.extui %26 : vector<2x128xi1> to vector<2x128xi32>
    %28 = arith.sitofp %27 : vector<2x128xi32> to vector<2x128xf32>
    %c0_10 = arith.constant 0 : index
    %c0_11 = arith.constant 0 : index
    %c0_12 = arith.constant 0 : index
    %29 = vector.load %arg6[%c0_10, %c0_11, %c0_12] : memref<1x2x32xf32, #tpu.memory_space<vmem>>, vector<1x2x32xf32>
    %30 = vector.shape_cast %29 : vector<1x2x32xf32> to vector<2x32xf32>
    %cst_13 = arith.constant dense<0.000000e+00> : vector<2x32xf32>
    %31 = tpu.matmul %28, %22, %cst_13 {dimension_numbers = #tpu.dot_dimension_numbers<[1], [0], [0], [1], [0, 0, 1, 1], [], []>} : vector<2x128xf32>, vector<128x32xf32>, vector<2x32xf32> -> vector<2x32xf32>
    %32 = arith.addf %30, %31 : vector<2x32xf32>
    %c0_14 = arith.constant 0 : index
    %c0_15 = arith.constant 0 : index
    %c0_16 = arith.constant 0 : index
    %33 = vector.load %arg6[%c0_14, %c0_15, %c0_16] : memref<1x2x32xf32, #tpu.memory_space<vmem>>, vector<1x2x32xf32>
    %34 = vector.shape_cast %33 : vector<1x2x32xf32> to vector<2x32xf32>
    %35 = vector.shape_cast %32 : vector<2x32xf32> to vector<1x2x32xf32>
    tpu.vector_store %arg6[%c0_14, %c0_15, %c0_16], %35 {strides = array<i32>} : memref<1x2x32xf32, #tpu.memory_space<vmem>>, vector<1x2x32xf32>,
    return
  }
  func.func @transform_0(%arg0: i32, %arg1: i32) -> (i32, i32) {
    %c1_i32 = arith.constant 1 : i32
    %0 = arith.muli %arg0, %c1_i32 : i32
    %1 = arith.addi %0, %arg1 : i32
    %c0_i32 = arith.constant 0 : i32
    %2 = arith.minsi %1, %c0_i32 : i32
    %c0_i32_0 = arith.constant 0 : i32
    %c0_i32_1 = arith.constant 0 : i32
    return %2, %c0_i32_0 : i32, i32
  }
  func.func @transform_1(%arg0: i32, %arg1: i32) -> (i32, i32) {
    %c1_i32 = arith.constant 1 : i32
    %0 = arith.muli %arg0, %c1_i32 : i32
    %1 = arith.addi %0, %arg1 : i32
    %c0_i32 = arith.constant 0 : i32
    %2 = arith.minsi %1, %c0_i32 : i32
    %c0_i32_0 = arith.constant 0 : i32
    %c0_i32_1 = arith.constant 0 : i32
    return %c0_i32_0, %2 : i32, i32
  }
  func.func @transform_2(%arg0: i32, %arg1: i32) -> (i32, i32) {
    %c0_i32 = arith.constant 0 : i32
    %c0_i32_0 = arith.constant 0 : i32
    %c0_i32_1 = arith.constant 0 : i32
    return %c0_i32, %c0_i32_0 : i32, i32
  }
  func.func @transform_3(%arg0: i32, %arg1: i32) -> (i32, i32) {
    %c0_i32 = arith.constant 0 : i32
    %c0_i32_0 = arith.constant 0 : i32
    %c0_i32_1 = arith.constant 0 : i32
    return %c0_i32, %c0_i32_0 : i32, i32
  }
  func.func @transform_4(%arg0: i32, %arg1: i32) -> (i32, i32, i32) {
    %c0_i32 = arith.constant 0 : i32
    %c0_i32_0 = arith.constant 0 : i32
    %c0_i32_1 = arith.constant 0 : i32
    return %arg0, %c0_i32, %c0_i32_0 : i32, i32, i32
  }
}

</mosaic_0001>

<bundles_post_ra>
// kernel: tpu_custom_call.1
= control target key start
LH: loop header
LB: loop body
LE: loop exit
PB: predicated region body
PF: predicated region fallthrough
CT: control target
= control target key end

     0   :  { %vm164_vm0 = vcmask 1043456   ;;  %vm115_vm1 = vcmask 31744   ;;  %s758_s0 = inlined_call_operand.vmem [shape: f32[16,4], index: 0, kind: input, shape index: {}]   ;;  %s759_s1 = inlined_call_operand.vmem [shape: s32[1,16], index: 1, kind: input, shape index: {}]   ;;  %s760_s2 = inlined_call_operand.vmem [shape: f32[4,32], index: 2, kind: input, shape index: {}]   ;;  %s761_s3 = inlined_call_operand.vmem [shape: f32[1,32], index: 3, kind: input, shape index: {}]   ;;  %s762_s4 = inlined_call_operand.hbm [shape: f32[1,2,32], index: 4, kind: output, shape index: {}]  }
   0x1   :  { %v107_v0 = vld [vmem:[%s760_s2] sm:$0xf]  ;;  %v92_v2 = vld [vmem:[%s758_s0 + $0x8] sm:$0xff] }
   0x2   :  { %v91_v1 = vld [vmem:[%s758_s0] sm:$0xff]  ;;  %574 = vmatprep.subr.msk.mxu0 %vm164_vm0, %v107_v0 }
   0x3   :  { %576 = vmatprep.mubr.msk.f32.mxu0 %vm115_vm1, %v91_v1 }
   0x4   :  { %9 = vsyncpa [#allocation3], 0  ;;  %575 = vmatpush3.msk.msra.mxu0 %vm164_vm0, %v107_v0  ;;  %610 = vmatprep.subr.msk.mxu1 %vm164_vm0, %v107_v0  ;;  %v101_v3 = vld [vmem:[%s758_s0 + $0x50] sm:$0xff]  ;;  %v102_v4 = vld [vmem:[%s758_s0 + $0x58] sm:$0xff]  ;;  %v641_v13 = vmov 0.0|0.0   ;;  %vm89_vm2 = vcmask 254976   ;;  %v330_v21 = vlaneseq }
   0x5   :  { %577 = vmatmul.mubr.msk.f32.vlgmr.msra.gmra.mrb[0].mxu0 %vm115_vm1, %v92_v2  ;;  %611 = vmatpush3.msk.msra.mxu1 %vm164_vm0, %v107_v0  ;;  %v93_v5 = vld [vmem:[%s758_s0 + $0x10] sm:$0xff]  ;;  %v94_v6 = vld [vmem:[%s758_s0 + $0x18] sm:$0xff]  ;;  %v103_v7 = vld [vmem:[%s758_s0 + $0x60] sm:$0xff]  ;;  %v642_v16 = vmov 0.0   ;;  %vm643_vm3 = vmmov 0   ;;  %v644_v30 = vmov 1.0  }
   0x6   :  { %591 = vmatprep.mubr.msk.f32.mxu1 %vm115_vm1, %v101_v3  ;;  %579 = vmatprep.mubr.msk.f32.mxu0 %vm115_vm1, %v93_v5  ;;  %v104_v8 = vld [vmem:[%s758_s0 + $0x68] sm:$0xff]  ;;  %v95_v9 = vld [vmem:[%s758_s0 + $0x20] sm:$0xff]  ;;  %v105_v11 = vld [vmem:[%s758_s0 + $0x70] sm:$0xff]  ;;  %90 = vst.msk [vmem:[#allocation2] sm:$0x3] %vm89_vm2, %v642_v16  ;;  %v331_v27 = vshrl.u32 %v330_v21, 7 }
   0x7   :  { %592 = vmatmul.mubr.msk.f32.vlgmr.msra.gmra.mrb[0].mxu1 %vm115_vm1, %v102_v4  ;;  %v96_v10 = vld [vmem:[%s758_s0 + $0x28] sm:$0xff]  ;;  %v106_v12 = vld [vmem:[%s758_s0 + $0x78] sm:$0xff]  ;;  %607 = vmatprep.subr.bf16.mxu1 %v641_v13  ;;  %v97_v14 = vld [vmem:[%s758_s0 + $0x30] sm:$0xff] }
   0x8   :  { %594 = vmatprep.mubr.msk.f32.mxu1 %vm115_vm1, %v103_v7  ;;  %v98_v15 = vld [vmem:[%s758_s0 + $0x38] sm:$0xff]  ;;  %v99_v17 = vld [vmem:[%s758_s0 + $0x40] sm:$0xff]  ;;  %v100_v18 = vld [vmem:[%s758_s0 + $0x48] sm:$0xff]  ;;  %s645_s0 = smov [#allocation2]  }
   0x9   :  { %580 = vmatmul.mubr.msk.f32.gmra.mrb[2].mxu0 %vm115_vm1, %v94_v6  ;;  %v533_v19 = vld [vmem:[%s761_s3] ss:$0 sm:$0xff] }
   0xa   :  { %582 = vmatprep.mubr.msk.f32.mxu0 %vm115_vm1, %v95_v9  ;;  %v551_v28 = vld [vmem:[%s759_s1] ss:$0 sm:$0xff]  ;;  %s516_s1 = sshll.u32 %s645_s0, 4  ;;  %s517_s1 = int_to_ptr.vmem [resolvable:$true] %s516_s1 }
   0xb   :  { %595 = vmatmul.mubr.msk.f32.gmra.mrb[2].mxu1 %vm115_vm1, %v104_v8  ;;  %vm433_vm4 = vcmp.eq.s32.totalorder %v331_v27, %v551_v28  ;;  %s617_s3 = scalar_lea.vmem %s517_s1, 32  ;;  %p622_p1 = scmp.lt.s32.totalorder %s517_s1, %s517_s1 }
   0xc   :  { %597 = vmatprep.mubr.msk.f32.mxu1 %vm115_vm1, %v105_v11  ;;  %p618_p0 = scmp.ne.s32.totalorder %s517_s1, %s617_s3  ;;  %p623_p2 = scmp.lt.s32.totalorder %s617_s3, %s617_s3 }
   0xd   :  { %583 = vmatmul.mubr.msk.f32.gmra.mrb[4].mxu0 %vm115_vm1, %v96_v10  ;;  %v436_v45 = vld [vmem:[#allocation2] sm:$0x3] }
   0xe   :  { %585 = vmatprep.mubr.msk.f32.mxu0 %vm115_vm1, %v97_v14  ;;  %p624_p3 = por %p623_p2, %p622_p1 }
   0xf   :  { %598 = vmatmul.mubr.msk.f32.gmra.mrb[4].mxu1 %vm115_vm1, %v106_v12 }
  0x10   :  { %604 = vmatprep.mubr.msk.f32.mxu1 %vm643_vm3, %v642_v16  ;;  %p625_p4 = pnand %p624_p3, %p618_p0 }
  0x11   :  { %586 = vmatmul.mubr.msk.f32.gmra.mrb[6].mxu0 %vm115_vm1, %v98_v15 }
  0x12   :  { %588 = vmatprep.mubr.msk.f32.mxu0 %vm115_vm1, %v99_v17 }
  0x15   :  { %589 = vmatmul.mubr.msk.f32.gmra.mrb[8].mxu0 %vm115_vm1, %v100_v18 }
  0xd8   :  { %v578_v20 = vpop.f32.mrb[0].mxu0 }
  0xd9   :  { %v240_v22 = vadd.f32 %v578_v20, %v533_v19  ;;  %v234_v23 = vpop.f32.mrb[1].mxu0 }
  0xda   :  { %v235_v24 = vadd.f32 %v533_v19, %v234_v23  ;;  %v593_v31 = vpop.f32.mrb[0].mxu1 }
  0xdb   :  { %v314_v25 = vmax.f32 %v240_v22, 0.0  ;;  %v284_v32 = vpop.f32.mrb[1].mxu1 }
  0xdc   :  { %v313_v26 = vmax.f32 %v235_v24, 0.0  ;;  %v581_v33 = vpop.f32.mrb[2].mxu0 }
  0xdd   :  { %v244_v34 = vpop.f32.mrb[3].mxu0 }
  0xde   :  { %v608_v29 = vpack.c.bf16 %v314_v25, %v313_v26  ;;  %v596_v35 = vpop.f32.mrb[2].mxu1 }
  0xdf   :  { %v294_v36 = vpop.f32.mrb[3].mxu1 }
  0xe0   :  { %609 = vmatpush3.bf16.msra.mxu1 %v608_v29  ;;  %v584_v37 = vpop.f32.mrb[4].mxu0 }
  0xe1   :  { %v254_v38 = vpop.f32.mrb[5].mxu0 }
  0xe2   :  { %v599_v39 = vpop.f32.mrb[4].mxu1 }
  0xe3   :  { %605 = vmatmul.mubr.msk.f32.vlgmr.msra.gmra.mrb[6].mxu1 %vm433_vm4, %v644_v30  ;;  %v304_v40 = vpop.f32.mrb[5].mxu1 }
  0xe4   :  { %v587_v41 = vpop.f32.mrb[6].mxu0 }
  0xe5   :  { %v264_v42 = vpop.f32.mrb[7].mxu0 }
  0xe8   :  { %v590_v43 = vpop.f32.mrb[8].mxu0 }
  0xe9   :  { %v274_v44 = vpop.f32.mrb[9].mxu0 }
 0x1b6   :  { %v503_v46 = vpop.f32.mrb[6].mxu1 }
 0x1b7   :  { %v507_v47 = vadd.f32 %v503_v46, %v436_v45  ;;  %v606_v48 = vpop.f32.mrb[7].mxu1 }
 0x1b9   :  { %509 = vst.msk [vmem:[#allocation2] sm:$0x3] %vm89_vm2, %v507_v47 }
 0x1ba   :  { %628 = shalt.err (!%p625_p4)
}
 0x1bb   :  { %s629_s27 = scalar_lea.hbm %s762_s4, 32 }
 0x1bc   :  { %p630_p5 = scmp.ne.s32.totalorder %s762_s4, %s629_s27  ;;  %p633_p6 = scmp.lt.u32.totalorder %s629_s27, %s762_s4 }
 0x1be   :  { %p635_p7 = pnand %p633_p6, %p630_p5 }
 0x1c0   :  { %638 = shalt.err (!%p635_p7)
}
 0x1c1   :  { %519 = dma.vmem_to_hbm [thread:$0]  %s517_s1, 32, %s762_s4, [#allocation3]  }
 0x1c2   :  { %639 = dma.done.wait [#allocation3], 32  }
 0x1c3   :  { %640 = vsyncadd [#allocation3], 4294967264 }
 0x1c4   :  { %523 = vsyncpa [#allocation3], 1 }

</bundles_post_ra>
